<compile_context>
chip_gen: v5e
topology: v5e:2x2
jax: 0.10.0
libtpu: 0.0.40
codegen_flags: <defaults>
</compile_context>

<pallas_src>
import functools

import jax
import jax.numpy as jnp
from jax import lax
from jax.experimental import pallas as pl
from jax.experimental.pallas import tpu as pltpu


def _resample2d_kernel(coords_ref, img_ref, flow_ref, out_ref, *, H, W, Hp, C):
    # coords_ref: (2, T)      f32  base (col, row) of each output pixel in tile
    # img_ref   : (C*Hp, Wp)  image for this batch element (resident across t)
    # flow_ref  : (2, T)      flow (dx, dy) for this tile
    # out_ref   : (C, T)      warped output tile
    T = out_ref.shape[-1]
    Wp = img_ref.shape[-1]

    x = coords_ref[0:1, :] + flow_ref[0:1, :].astype(jnp.float32)   # (1, T)
    y = coords_ref[1:2, :] + flow_ref[1:2, :].astype(jnp.float32)   # (1, T)

    x0f = jnp.floor(x)
    y0f = jnp.floor(y)
    x0 = x0f.astype(jnp.int32)
    y0 = y0f.astype(jnp.int32)
    x1 = x0 + 1
    y1 = y0 + 1
    wx1 = x - x0f
    wx0 = 1.0 - wx1
    wy1 = y - y0f
    wy0 = 1.0 - wy1

    def axis_mix(i0, i1, w0, w1, n_valid, n_rows):
        # (n_rows, T) mixing matrix: w0*onehot(i0) + w1*onehot(i1).
        # zeros padding: out-of-bounds corners contribute nothing.
        iota = lax.broadcasted_iota(jnp.int32, (n_rows, T), 0)
        v0 = jnp.where((i0 >= 0) & (i0 < n_valid), w0, 0.0)
        v1 = jnp.where((i1 >= 0) & (i1 < n_valid), w1, 0.0)
        i0c = jnp.clip(i0, 0, n_valid - 1)
        i1c = jnp.clip(i1, 0, n_valid - 1)
        return (jnp.where(iota == i0c, v0, 0.0)
                + jnp.where(iota == i1c, v1, 0.0))

    cx = axis_mix(x0, x1, wx0, wx1, W, Wp)    # (Wp, T)  column (x) mix
    ry = axis_mix(y0, y1, wy0, wy1, H, Hp)    # (Hp, T)  row (y) mix

    # Horizontal pass on the MXU: (C*Hp, Wp) @ (Wp, T) -> (C*Hp, T)
    hor = jnp.dot(img_ref[...].astype(jnp.float32), cx,
                  preferred_element_type=jnp.float32)
    # Vertical pass: per-channel weighted reduce over Hp (tile-aligned reshape).
    out = jnp.sum(hor.reshape(C, Hp, T) * ry[None, :, :], axis=1)   # (C, T)
    out_ref[...] = out.astype(out_ref.dtype)


def _round_up(a, m):
    return (a + m - 1) // m * m


def resample2d(input1, input2, kernel_size=2, dilation=1, sigma=5,
               tile_out=256):
    """Pallas equivalent of Resample2d.forward.

    input1: (B, C, H, W) image / feature map
    input2: (B, 2, H, W) or (B, 3, H, W) flow (dx, dy[, ignored])
    """
    # kernel_size / dilation / sigma are stored by the PyTorch module but are
    # unused in its forward pass; kept for signature parity.
    del kernel_size, dilation, sigma

    B, C, H, W = input1.shape
    if input2.shape[1] == 3:
        input2 = input2[:, :2, :, :]
    HW = H * W

    # Lane-dense output tile (multiple of 128).
    T = max(128, _round_up(min(tile_out, HW), 128))
    hw_pad = _round_up(HW, T)
    n_tiles = hw_pad // T

    # Pad image so the resident block and all in-kernel ops are tile aligned.
    # NOTE: for very large C*H*W the resident image block could exceed VMEM;
    # for such sizes the H axis would also need tiling (reduction axis).
    Hp = _round_up(H, 8)
    Wp = _round_up(W, 128)
    img = jnp.pad(input1, ((0, 0), (0, 0), (0, Hp - H), (0, Wp - W)))
    img = img.reshape(B, C * Hp, Wp)

    # Flow: flatten spatial, pad to a whole number of tiles (padded output
    # pixels land on rows >= H -> zero weight -> sliced off below).
    flow = input2.reshape(B, 2, HW)
    flow = jnp.pad(flow, ((0, 0), (0, 0), (0, hw_pad - HW)))

    # Base pixel coordinates (col, row) of every (possibly padded) output pixel
    # -- avoids integer div/mod inside the kernel.
    pix = jnp.arange(hw_pad, dtype=jnp.int32)
    coords = jnp.stack([(pix % W).astype(jnp.float32),
                        (pix // W).astype(jnp.float32)], axis=0)   # (2, hw_pad)

    out = pl.pallas_call(
        functools.partial(_resample2d_kernel, H=H, W=W, Hp=Hp, C=C),
        out_shape=jax.ShapeDtypeStruct((B, C, hw_pad), input1.dtype),
        grid=(B, n_tiles),
        in_specs=[
            pl.BlockSpec((2, T), lambda b, t: (0, t)),                 # coords
            pl.BlockSpec((None, C * Hp, Wp), lambda b, t: (b, 0, 0)),  # image (resident over t)
            pl.BlockSpec((None, 2, T), lambda b, t: (b, 0, t)),        # flow tile
        ],
        out_specs=pl.BlockSpec((None, C, T), lambda b, t: (b, 0, t)),
        compiler_params=pltpu.CompilerParams(
            dimension_semantics=("parallel", "parallel")),
    )(coords, img, flow)

    return out[:, :, :HW].reshape(B, C, H, W)


def resample2d_ref(input1, input2):
    """Pure-JAX reference (bilinear warp, zeros padding, align_corners=True)."""
    B, C, H, W = input1.shape
    if input2.shape[1] == 3:
        input2 = input2[:, :2, :, :]
    dx = input2[:, 0]
    dy = input2[:, 1]
    gx = jnp.arange(W, dtype=jnp.float32)[None, None, :]
    gy = jnp.arange(H, dtype=jnp.float32)[None, :, None]
    x = gx + dx
    y = gy + dy
    x0f = jnp.floor(x)
    y0f = jnp.floor(y)
    x0 = x0f.astype(jnp.int32)
    y0 = y0f.astype(jnp.int32)
    x1 = x0 + 1
    y1 = y0 + 1
    wx1 = x - x0f
    wx0 = 1.0 - wx1
    wy1 = y - y0f
    wy0 = 1.0 - wy1

    def sample(xi, yi, w):
        valid = (xi >= 0) & (xi < W) & (yi >= 0) & (yi < H)
        xic = jnp.clip(xi, 0, W - 1)
        yic = jnp.clip(yi, 0, H - 1)

        def gather_one(img_b, yb, xb):
            return img_b[:, yb, xb]  # (C, H, W)

        vals = jax.vmap(gather_one)(input1, yic, xic)  # (B, C, H, W)
        return vals * (w * valid.astype(jnp.float32))[:, None]

    return (sample(x0, y0, wx0 * wy0) + sample(x1, y0, wx1 * wy0)
            + sample(x0, y1, wx0 * wy1) + sample(x1, y1, wx1 * wy1))


if __name__ == "__main__":
    key = jax.random.PRNGKey(0)
    k1, k2, k3, k4 = jax.random.split(key, 4)

    # Test 1: the canonical small shape (single output tile).
    B, C, H, W = 2, 4, 16, 16
    input1 = jax.random.normal(k1, (B, C, H, W), dtype=jnp.float32)
    # Displacements of a few pixels; some samples fall out of bounds to
    # exercise the zeros-padding path.
    input2 = 3.0 * jax.random.normal(k2, (B, 2, H, W), dtype=jnp.float32)

    out = resample2d(input1, input2)
    jax.block_until_ready(out)
    ref = resample2d_ref(input1, input2)
    assert out.shape == (B, C, H, W)
    assert jnp.allclose(out, ref, atol=1e-4, rtol=1e-4), (
        f"max abs err {jnp.max(jnp.abs(out - ref))}")

    # Test 2: non-square spatial size with a padded remainder tile, 3-channel
    # flow input (extra channel ignored), odd H/W (exercises H/W padding).
    B2, C2, H2, W2 = 2, 3, 20, 24
    a1 = jax.random.normal(k3, (B2, C2, H2, W2), dtype=jnp.float32)
    a2 = 4.0 * jax.random.normal(k4, (B2, 3, H2, W2), dtype=jnp.float32)

    out2 = resample2d(a1, a2)
    jax.block_until_ready(out2)
    ref2 = resample2d_ref(a1, a2)
    assert out2.shape == (B2, C2, H2, W2)
    assert jnp.allclose(out2, ref2, atol=1e-4, rtol=1e-4), (
        f"max abs err {jnp.max(jnp.abs(out2 - ref2))}")

    print("KERNEL_OK")
</pallas_src>

<mosaic_0001>
module attributes {stable_mosaic.version = 11 : i64} {
  func.func @_resample2d_kernel(%arg0: i32, %arg1: i32, %arg2: memref<2x256xf32, #tpu.memory_space<vmem>>, %arg3: memref<1x64x128xf32, #tpu.memory_space<vmem>>, %arg4: memref<1x2x256xf32, #tpu.memory_space<vmem>>, %arg5: memref<1x4x256xf32, #tpu.memory_space<vmem>>) attributes {dimension_semantics = [#tpu.dimension_semantics<parallel>, #tpu.dimension_semantics<parallel>], iteration_bounds = array<i64: 2, 1>, scalar_prefetch = 0 : i64, scratch_operands = 0 : i64, tpu.core_type = #tpu.core_type<tc>, window_params = [{transform_indices = @transform_0, window_bounds = array<i64: 2, 256>}, {transform_indices = @transform_1, window_bounds = array<i64: 1, 64, 128>}, {transform_indices = @transform_2, window_bounds = array<i64: 1, 2, 256>}, {transform_indices = @transform_3, window_bounds = array<i64: 1, 4, 256>}]} {
    %c0 = arith.constant 0 : index
    %c0_0 = arith.constant 0 : index
    %0 = vector.load %arg2[%c0, %c0_0] : memref<2x256xf32, #tpu.memory_space<vmem>>, vector<1x256xf32>
    %c0_1 = arith.constant 0 : index
    %c0_2 = arith.constant 0 : index
    %c0_3 = arith.constant 0 : index
    %1 = vector.load %arg4[%c0_1, %c0_2, %c0_3] : memref<1x2x256xf32, #tpu.memory_space<vmem>>, vector<1x1x256xf32>
    %2 = vector.shape_cast %1 : vector<1x1x256xf32> to vector<1x256xf32>
    %3 = arith.addf %0, %2 : vector<1x256xf32>
    %c1 = arith.constant 1 : index
    %c0_4 = arith.constant 0 : index
    %4 = vector.load %arg2[%c1, %c0_4] : memref<2x256xf32, #tpu.memory_space<vmem>>, vector<1x256xf32>
    %c0_5 = arith.constant 0 : index
    %c1_6 = arith.constant 1 : index
    %c0_7 = arith.constant 0 : index
    %5 = vector.load %arg4[%c0_5, %c1_6, %c0_7] : memref<1x2x256xf32, #tpu.memory_space<vmem>>, vector<1x1x256xf32>
    %6 = vector.shape_cast %5 : vector<1x1x256xf32> to vector<1x256xf32>
    %7 = arith.addf %4, %6 : vector<1x256xf32>
    %8 = math.floor %3 : vector<1x256xf32>
    %9 = math.floor %7 : vector<1x256xf32>
    %10 = arith.fptosi %8 : vector<1x256xf32> to vector<1x256xi32>
    %11 = arith.fptosi %9 : vector<1x256xf32> to vector<1x256xi32>
    %c1_i32 = arith.constant 1 : i32
    %12 = vector.broadcast %c1_i32 : i32 to vector<1x256xi32>
    %13 = arith.addi %10, %12 : vector<1x256xi32>
    %c1_i32_8 = arith.constant 1 : i32
    %14 = vector.broadcast %c1_i32_8 : i32 to vector<1x256xi32>
    %15 = arith.addi %11, %14 : vector<1x256xi32>
    %16 = arith.subf %3, %8 : vector<1x256xf32>
    %cst = arith.constant 1.000000e+00 : f32
    %17 = vector.broadcast %cst : f32 to vector<1x256xf32>
    %18 = arith.subf %17, %16 : vector<1x256xf32>
    %19 = arith.subf %7, %9 : vector<1x256xf32>
    %cst_9 = arith.constant 1.000000e+00 : f32
    %20 = vector.broadcast %cst_9 : f32 to vector<1x256xf32>
    %21 = arith.subf %20, %19 : vector<1x256xf32>
    %22 = tpu.iota {dimensions = array<i32: 0>} : vector<128x256xi32>
    %c0_i32 = arith.constant 0 : i32
    %23 = vector.broadcast %c0_i32 : i32 to vector<1x256xi32>
    %24 = arith.cmpi sge, %10, %23 : vector<1x256xi32>
    %c16_i32 = arith.constant 16 : i32
    %25 = vector.broadcast %c16_i32 : i32 to vector<1x256xi32>
    %26 = arith.cmpi slt, %10, %25 : vector<1x256xi32>
    %27 = arith.andi %24, %26 : vector<1x256xi1>
    %cst_10 = arith.constant 0.000000e+00 : f32
    %28 = vector.broadcast %cst_10 : f32 to vector<1x256xf32>
    %29 = arith.select %27, %18, %28 : vector<1x256xi1>, vector<1x256xf32>
    %c0_i32_11 = arith.constant 0 : i32
    %30 = vector.broadcast %c0_i32_11 : i32 to vector<1x256xi32>
    %31 = arith.cmpi sge, %13, %30 : vector<1x256xi32>
    %c16_i32_12 = arith.constant 16 : i32
    %32 = vector.broadcast %c16_i32_12 : i32 to vector<1x256xi32>
    %33 = arith.cmpi slt, %13, %32 : vector<1x256xi32>
    %34 = arith.andi %31, %33 : vector<1x256xi1>
    %cst_13 = arith.constant 0.000000e+00 : f32
    %35 = vector.broadcast %cst_13 : f32 to vector<1x256xf32>
    %36 = arith.select %34, %16, %35 : vector<1x256xi1>, vector<1x256xf32>
    %c0_i32_14 = arith.constant 0 : i32
    %c15_i32 = arith.constant 15 : i32
    %37 = vector.broadcast %c0_i32_14 : i32 to vector<1x256xi32>
    %38 = arith.maxsi %37, %10 : vector<1x256xi32>
    %39 = vector.broadcast %c15_i32 : i32 to vector<1x256xi32>
    %40 = arith.minsi %39, %38 : vector<1x256xi32>
    %c0_i32_15 = arith.constant 0 : i32
    %c15_i32_16 = arith.constant 15 : i32
    %41 = vector.broadcast %c0_i32_15 : i32 to vector<1x256xi32>
    %42 = arith.maxsi %41, %13 : vector<1x256xi32>
    %43 = vector.broadcast %c15_i32_16 : i32 to vector<1x256xi32>
    %44 = arith.minsi %43, %42 : vector<1x256xi32>
    %45 = vector.broadcast %40 : vector<1x256xi32> to vector<128x256xi32>
    %46 = arith.cmpi eq, %22, %45 : vector<128x256xi32>
    %cst_17 = arith.constant 0.000000e+00 : f32
    %47 = vector.shape_cast %29 : vector<1x256xf32> to vector<1x256xf32>
    %48 = vector.broadcast %47 : vector<1x256xf32> to vector<128x256xf32>
    %49 = vector.broadcast %cst_17 : f32 to vector<128x256xf32>
    %50 = arith.select %46, %48, %49 : vector<128x256xi1>, vector<128x256xf32>
    %51 = vector.broadcast %44 : vector<1x256xi32> to vector<128x256xi32>
    %52 = arith.cmpi eq, %22, %51 : vector<128x256xi32>
    %cst_18 = arith.constant 0.000000e+00 : f32
    %53 = vector.shape_cast %36 : vector<1x256xf32> to vector<1x256xf32>
    %54 = vector.broadcast %53 : vector<1x256xf32> to vector<128x256xf32>
    %55 = vector.broadcast %cst_18 : f32 to vector<128x256xf32>
    %56 = arith.select %52, %54, %55 : vector<128x256xi1>, vector<128x256xf32>
    %57 = arith.addf %50, %56 : vector<128x256xf32>
    %58 = tpu.iota {dimensions = array<i32: 0>} : vector<16x256xi32>
    %c0_i32_19 = arith.constant 0 : i32
    %59 = vector.broadcast %c0_i32_19 : i32 to vector<1x256xi32>
    %60 = arith.cmpi sge, %11, %59 : vector<1x256xi32>
    %c16_i32_20 = arith.constant 16 : i32
    %61 = vector.broadcast %c16_i32_20 : i32 to vector<1x256xi32>
    %62 = arith.cmpi slt, %11, %61 : vector<1x256xi32>
    %63 = arith.andi %60, %62 : vector<1x256xi1>
    %cst_21 = arith.constant 0.000000e+00 : f32
    %64 = vector.broadcast %cst_21 : f32 to vector<1x256xf32>
    %65 = arith.select %63, %21, %64 : vector<1x256xi1>, vector<1x256xf32>
    %c0_i32_22 = arith.constant 0 : i32
    %66 = vector.broadcast %c0_i32_22 : i32 to vector<1x256xi32>
    %67 = arith.cmpi sge, %15, %66 : vector<1x256xi32>
    %c16_i32_23 = arith.constant 16 : i32
    %68 = vector.broadcast %c16_i32_23 : i32 to vector<1x256xi32>
    %69 = arith.cmpi slt, %15, %68 : vector<1x256xi32>
    %70 = arith.andi %67, %69 : vector<1x256xi1>
    %cst_24 = arith.constant 0.000000e+00 : f32
    %71 = vector.broadcast %cst_24 : f32 to vector<1x256xf32>
    %72 = arith.select %70, %19, %71 : vector<1x256xi1>, vector<1x256xf32>
    %c0_i32_25 = arith.constant 0 : i32
    %c15_i32_26 = arith.constant 15 : i32
    %73 = vector.broadcast %c0_i32_25 : i32 to vector<1x256xi32>
    %74 = arith.maxsi %73, %11 : vector<1x256xi32>
    %75 = vector.broadcast %c15_i32_26 : i32 to vector<1x256xi32>
    %76 = arith.minsi %75, %74 : vector<1x256xi32>
    %c0_i32_27 = arith.constant 0 : i32
    %c15_i32_28 = arith.constant 15 : i32
    %77 = vector.broadcast %c0_i32_27 : i32 to vector<1x256xi32>
    %78 = arith.maxsi %77, %15 : vector<1x256xi32>
    %79 = vector.broadcast %c15_i32_28 : i32 to vector<1x256xi32>
    %80 = arith.minsi %79, %78 : vector<1x256xi32>
    %81 = vector.broadcast %76 : vector<1x256xi32> to vector<16x256xi32>
    %82 = arith.cmpi eq, %58, %81 : vector<16x256xi32>
    %cst_29 = arith.constant 0.000000e+00 : f32
    %83 = vector.shape_cast %65 : vector<1x256xf32> to vector<1x256xf32>
    %84 = vector.broadcast %83 : vector<1x256xf32> to vector<16x256xf32>
    %85 = vector.broadcast %cst_29 : f32 to vector<16x256xf32>
    %86 = arith.select %82, %84, %85 : vector<16x256xi1>, vector<16x256xf32>
    %87 = vector.broadcast %80 : vector<1x256xi32> to vector<16x256xi32>
    %88 = arith.cmpi eq, %58, %87 : vector<16x256xi32>
    %cst_30 = arith.constant 0.000000e+00 : f32
    %89 = vector.shape_cast %72 : vector<1x256xf32> to vector<1x256xf32>
    %90 = vector.broadcast %89 : vector<1x256xf32> to vector<16x256xf32>
    %91 = vector.broadcast %cst_30 : f32 to vector<16x256xf32>
    %92 = arith.select %88, %90, %91 : vector<16x256xi1>, vector<16x256xf32>
    %93 = arith.addf %86, %92 : vector<16x256xf32>
    %c0_31 = arith.constant 0 : index
    %c0_32 = arith.constant 0 : index
    %c0_33 = arith.constant 0 : index
    %94 = vector.load %arg3[%c0_31, %c0_32, %c0_33] : memref<1x64x128xf32, #tpu.memory_space<vmem>>, vector<1x64x128xf32>
    %95 = vector.shape_cast %94 : vector<1x64x128xf32> to vector<64x128xf32>
    %cst_34 = arith.constant dense<0.000000e+00> : vector<64x256xf32>
    %96 = tpu.matmul %95, %57, %cst_34 {dimension_numbers = #tpu.dot_dimension_numbers<[1], [0], [0], [1], [0, 0, 1, 1], [], []>} : vector<64x128xf32>, vector<128x256xf32>, vector<64x256xf32> -> vector<64x256xf32>
    %97 = vector.shape_cast %96 : vector<64x256xf32> to vector<4x16x256xf32>
    %98 = vector.shape_cast %93 : vector<16x256xf32> to vector<1x16x256xf32>
    %99 = vector.broadcast %98 : vector<1x16x256xf32> to vector<4x16x256xf32>
    %100 = arith.mulf %97, %99 : vector<4x16x256xf32>
    %cst_35 = arith.constant dense<0.000000e+00> : vector<4x256xf32>
    %101 = vector.multi_reduction <add>, %100, %cst_35 [1] : vector<4x16x256xf32> to vector<4x256xf32>
    %c0_36 = arith.constant 0 : index
    %c0_37 = arith.constant 0 : index
    %c0_38 = arith.constant 0 : index
    %102 = vector.load %arg5[%c0_36, %c0_37, %c0_38] : memref<1x4x256xf32, #tpu.memory_space<vmem>>, vector<1x4x256xf32>
    %103 = vector.shape_cast %102 : vector<1x4x256xf32> to vector<4x256xf32>
    %104 = vector.shape_cast %101 : vector<4x256xf32> to vector<1x4x256xf32>
    tpu.vector_store %arg5[%c0_36, %c0_37, %c0_38], %104 {strides = array<i32>} : memref<1x4x256xf32, #tpu.memory_space<vmem>>, vector<1x4x256xf32>,
    return
  }
  func.func @transform_0(%arg0: i32, %arg1: i32) -> (i32, i32) {
    %c0_i32 = arith.constant 0 : i32
    %c0_i32_0 = arith.constant 0 : i32
    return %c0_i32, %arg1 : i32, i32
  }
  func.func @transform_1(%arg0: i32, %arg1: i32) -> (i32, i32, i32) {
    %c0_i32 = arith.constant 0 : i32
    %c0_i32_0 = arith.constant 0 : i32
    %c0_i32_1 = arith.constant 0 : i32
    return %arg0, %c0_i32, %c0_i32_0 : i32, i32, i32
  }
  func.func @transform_2(%arg0: i32, %arg1: i32) -> (i32, i32, i32) {
    %c0_i32 = arith.constant 0 : i32
    %c0_i32_0 = arith.constant 0 : i32
    return %arg0, %c0_i32, %arg1 : i32, i32, i32
  }
  func.func @transform_3(%arg0: i32, %arg1: i32) -> (i32, i32, i32) {
    %c0_i32 = arith.constant 0 : i32
    %c0_i32_0 = arith.constant 0 : i32
    return %arg0, %c0_i32, %arg1 : i32, i32, i32
  }
}

</mosaic_0001>

<bundles_post_ra>
// kernel: tpu_custom_call.1
= control target key start
LH: loop header
LB: loop body
LE: loop exit
PB: predicated region body
PF: predicated region fallthrough
CT: control target
= control target key end

     0   :  { %8 = vsyncpa [#allocation3], 0  ;;  %s1670_s0 = inlined_call_operand.hbm [shape: f32[2,256], index: 0, kind: input, shape index: {}]   ;;  %s1671_s1 = inlined_call_operand.hbm [shape: f32[2,64,128], index: 1, kind: input, shape index: {}]   ;;  %s1672_s2 = inlined_call_operand.hbm [shape: f32[2,2,256], index: 2, kind: input, shape index: {}]   ;;  %s1673_s3 = inlined_call_operand.hbm [shape: f32[2,4,256], index: 3, kind: output, shape index: {}]  }
   0x1   :  { %9 = vsyncpa [#allocation6], 0 }
   0x2   :  { %11 = vsyncpa [#allocation6 + $0x1], 0 }
   0x3   :  { %12 = vsyncpa [#allocation4], 0 }
   0x4   :  { %14 = vsyncpa [#allocation4 + $0x1], 0  ;;  %s1222_s12 = smov 0   ;;  %s1224_s13 = smov 0  }
   0x5   :  { %s1226_s14 = smov 0   ;;  %s1228_s15 = smov 0  }
   0x6   :  { %s1230_s16 = smov 0   ;;  %s1232_s17 = smov 0  }
   0x7 LB: > { %s32_s18 = sadd.s32 1, %s1193_s16  ;;  %s65_s19 = sadd.s32 1, %s1185_s14  ;;  %s1197_s17 = sphi %s1232_s17, %s20_s17   ;;  %s1193_s16 = sphi %s1230_s16, %s1684_s16   ;;  %s1189_s15 = sphi %s1228_s15, %s1683_s15   ;;  %s1185_s14 = sphi %s1226_s14, %s1682_s14   ;;  %s1181_s13 = sphi %s1224_s13, %s1681_s13   ;;  %s1177_s12 = sphi %s1222_s12, %s1680_s12  }
   0x8   : > { %p34_p0 = scmp.ge.s32.totalorder %s32_s18, 2  ;;  %p72_p1 = scmp.ne.s32.totalorder %s1185_s14, %s1181_s13 }
   0x9   : > { %p73_p2 = scmp.eq.s32.totalorder %s1197_s17, 0  ;;  %p884_p3 = scmp.ge.s32.totalorder %s1197_s17, 2 }
   0xa   : > { %s1686_s18 = smov (%p34_p0, %s32_s18), 0  ;;  %p967_p5 = scmp.lt.s32.totalorder %s1197_s17, 2 }
   0xb   : > { %p1263_p4 = por %p73_p2, %p72_p1  ;;  %s62_s21 = ssub.s32 %s1193_s16, %s1686_s18 }
   0xc   : > { %s173_s22 = sand.u32 1, %s1197_s17   ;;  %p63_p6 = scmp.eq.s32.totalorder %s62_s21, 0 }
   0xd   : > { %s175_s23 = sand.u32 1, %s1185_s14   ;;  %s902_s24 = sshll.u32 %s1193_s16, 6 }
   0xe   : > { %s1274_s25 = scalar_select %p63_p6, %s1185_s14, %s65_s19  }
   0xf   : > { %s885_s26 = sshll.u32 %s175_s23, 6  ;;  %s182_s29 = scalar_lea.hbm %s1671_s1, %s902_s24 }
  0x10   : > { %s183_s30 = sshll.u32 %s182_s29, 4  ;;  %s177_s4 = scalar_lea.vmem [#allocation5], %s885_s26  ;;  %s184_s30 = int_to_ptr.hbm [resolvable:$true] %s183_s30 }
  0x11   : > { %s185_s5 = sshll.u32 %s177_s4, 4  ;;  %p1283_p7 = pnand %p967_p5, %p1263_p4  ;;  %s186_s5 = int_to_ptr.vmem [resolvable:$true] %s185_s5 }
  0x12   : > { %s1287_s7 = scalar_lea.sflag [#allocation6], %s173_s22  ;;  %s1199_s8 = smov 128  }
  0x13   : > { %s1200_s9 = smov 8   ;;  %s1293_s10 = sadd.s32 4294967295, %s1197_s17  }
  0x14   : > { %958 = dma.hbm_to_vmem [thread:$0]  (!%p1283_p7), %s184_s30, 1024, %s186_s5, %s1287_s7, %s1199_s8, %s1199_s8, %s1200_s9  }
  0x15   : > { %s881_s11 = sadd.s32 4294967294, %s1197_s17   ;;  %p78_p8 = scmp.ne.s32.totalorder %s1181_s13, %s1177_s12 }
  0x16   : > { %p79_p9 = scmp.eq.s32.totalorder %s1293_s10, 0  ;;  %p132_p10 = scmp.eq.s32.totalorder %s1293_s10, 1 }
  0x17   : > { %p138_p11 = scmp.eq.s32.totalorder %s881_s11, 1  ;;  %p882_p12 = scmp.ge.s32.totalorder %s1197_s17, 1 }
  0x18   : > { %p1303_p13 = por %p79_p9, %p78_p8  ;;  %p1310_p0 = por %p132_p10, %p72_p1 }
  0x19   : > { %p1314_p2 = por %p138_p11, %p78_p8  ;;  %p145_p4 = scmp.lt.s32.totalorder %s1197_s17, 3 }
  0x1a   : > { %s160_s26 = sshll.u32 %s1670_s0, 4  ;;  %s888_s28 = sshll.u32 %s175_s23, 2  ;;  %s161_s26 = int_to_ptr.hbm [resolvable:$true] %s160_s26 }
  0x1b   : > { %p1322_p5 = pnand %p882_p12, %p145_p4  ;;  %s1201_s29 = smov [#allocation2]  }
  0x1c   : > { %s162_s30 = sshll.u32 %s1201_s29, 4  ;;  %s903_s4 = sshll.u32 %s1193_s16, 2  ;;  %s163_s30 = int_to_ptr.vmem [resolvable:$true] %s162_s30 }
  0x1d   : > { %p951_p1 = pneg %p1322_p5  ;;  %s206_s9 = scalar_lea.hbm %s1672_s2, %s903_s4 }
  0x1e   : > { %s199_s11 = scalar_lea.vmem [#allocation7], %s888_s28  ;;  %s208_s24 = sshll.u32 %s206_s9, 4  ;;  %s209_s24 = int_to_ptr.hbm [resolvable:$true] %s208_s24 }
  0x1f   : > { %p952_p6 = pnand %p951_p1, %p79_p9  ;;  %s210_s22 = sshll.u32 %s199_s11, 4  ;;  %s211_s22 = int_to_ptr.vmem [resolvable:$true] %s210_s22 }
  0x20   : > { %961 = dma.hbm_to_vmem [thread:$0]  (!%p1283_p7), %s209_s24, 64, %s211_s22, %s1287_s7  }
  0x21   : > { %954 = dma.hbm_to_vmem [thread:$0]  (!%p952_p6), %s161_s26, 64, %s163_s30, [#allocation3]  }
  0x22   : > { %219 = sbr.rel (%p1322_p5) target bundleno = 288 (0x120), region = 32 }
  0x27   : > { %1164 = dma.done.wait (%p79_p9), [#allocation3], 64  }
  0x28   : > { %1166 = vsyncadd (%p79_p9), [#allocation3], 4294967232  ;;  %s226_s23 = sand.u32 1, %s1293_s10   ;;  %s1345_s28 = sand.u32 1, %s1181_s13  }
  0x29   : > { %s893_s26 = sshll.u32 %s1345_s28, 6  ;;  %s227_s29 = scalar_lea.sflag [#allocation6], %s226_s23 }
  0x2a   : > { %s1348_s6 = scalar_lea.vmem [#allocation5], %s893_s26 }
  0x2b   : > { %1168 = dma.done.wait (%p1303_p13), %s227_s29, 1088  }
  0x2c   : > { %1170 = vsyncadd (%p1303_p13), %s227_s29, 4294966208  ;;  %s894_s7 = sshll.u32 %s1345_s28, 2  ;;  %v290_v0 = vlaneseq  ;;  %v272_v2 = vld [vmem:[#allocation2] ss:$2 sm:$0x3]  ;;  %s895_s10 = sshll.u32 %s1345_s28, 3 }
  0x2d   : > { %s1357_s27 = scalar_lea.vmem [#allocation7], %s894_s7  ;;  %s904_s19 = sshll.u32 %s1189_s15, 3 }
  0x2e   : > { %v1355_v1 = vshrl.u32 %v290_v0, 7  ;;  %v273_v3 = vld [vmem:[%s1357_s27] ss:$2 sm:$0x3]  ;;  %s757_s5 = scalar_lea.hbm %s1673_s3, %s904_s19  ;;  %s268_s15 = scalar_lea.vmem [#allocation8], %s895_s10 }
  0x2f   : > { %v274_v4 = vadd.f32 %v273_v3, %v272_v2  ;;  %s759_s8 = sshll.u32 %s268_s15, 4  ;;  %s761_s9 = sshll.u32 %s757_s5, 4  ;;  %s760_s8 = int_to_ptr.vmem [resolvable:$true] %s759_s8  ;;  %s762_s9 = int_to_ptr.hbm [resolvable:$true] %s761_s9 }
  0x30   : > { %v306_v6 = vadd.s32 120, %v1355_v1  ;;  %v305_v9 = vadd.s32 112, %v1355_v1  ;;  %v1363_v10 = vadd.s32 104, %v1355_v1  ;;  %v1366_v11 = vadd.s32 96, %v1355_v1  ;;  %s744_s11 = scalar_lea.sflag [#allocation4], %s1345_s28  ;;  %s1125_s22 = sshra.s32 %s762_s9, 4  ;;  %s1126_s22 = int_to_ptr.hbm [resolvable:$true] %s1125_s22 }
  0x31   : > { %v280_v5 = vfloor.f32 %v274_v4  ;;  %v1369_v12 = vadd.s32 88, %v1355_v1  ;;  %v1372_v13 = vadd.s32 80, %v1355_v1  ;;  %v1375_v14 = vadd.s32 72, %v1355_v1  ;;  %s1127_s24 = scalar_lea.hbm %s1126_s22, 8  ;;  %s1131_s29 = scalar_lea.hbm %s1673_s3, 16 }
  0x32   : > { %v1378_v17 = vadd.s32 64, %v1355_v1  ;;  %v1381_v18 = vadd.s32 56, %v1355_v1  ;;  %v1384_v19 = vadd.s32 48, %v1355_v1  ;;  %v1389_v23 = vadd.s32 40, %v1355_v1  ;;  %p1128_p7 = scmp.ne.s32.totalorder %s1126_s22, %s1127_s24  ;;  %p1132_p10 = scmp.lt.s32.totalorder %s1126_s22, %s1673_s3 }
  0x33   : > { %v938_v7 = vcvt.f32.s32 %v280_v5  ;;  %v286_v8 = vsub.f32 %v274_v4, %v280_v5  ;;  %v1398_v30 = vadd.s32 32, %v1355_v1  ;;  %v1405_v34 = vadd.s32 24, %v1355_v1  ;;  %p1133_p11 = scmp.lt.s32.totalorder %s1131_s29, %s1127_s24 }
  0x34   : > { %v1441_v53 = vadd.s32 16, %v1355_v1  ;;  %p1129_p8 = pnand %p1128_p7, %p1310_p0 }
  0x35   : > { %v284_v15 = vadd.s32 1, %v938_v7  ;;  %v287_v16 = vsub.f32 1.0, %v286_v8  ;;  %vm307_vm0 = vcmp.ge.s32.totalorder %v938_v7, 0  ;;  %vm308_vm1 = vcmp.lt.s32.totalorder %v938_v7, 16  ;;  %p1134_p12 = por %p1133_p11, %p1132_p10 }
  0x36   : > { %vm309_vm2 = vmand %vm307_vm0, %vm308_vm1  ;;  %vm315_vm3 = vcmp.gt.s32.totalorder %v938_v7, 0  ;;  %p1130_p9 = pneg %p1129_p8 }
  0x37   : > { %v310_v20 = vsel %vm309_vm2, %v287_v16, 0.0  ;;  %vm311_vm4 = vcmp.ge.s32.totalorder %v284_v15, 0  ;;  %vm312_vm5 = vcmp.lt.s32.totalorder %v284_v15, 16  ;;  %v316_v21 = vsel %vm315_vm3, %v938_v7, 0 }
  0x38   : > { %vm313_vm6 = vmand %vm311_vm4, %vm312_vm5  ;;  %vm317_vm7 = vcmp.lt.s32.totalorder %v316_v21, 15  ;;  %vm319_vm8 = vcmp.gt.s32.totalorder %v284_v15, 0  ;;  %v1386_v22 = vperm.slane %v310_v20, 0  ;;  %v1391_v27 = vperm.slane %v310_v20, 1  ;;  %p1135_p13 = pnand %p1134_p12, %p1130_p9 }
  0x39   : > { %v314_v24 = vsel %vm313_vm6, %v286_v8, 0.0  ;;  %v318_v25 = vsel %vm317_vm7, %v316_v21, 15  ;;  %v320_v26 = vsel %vm319_vm8, %v284_v15, 0 }
  0x3a   : > { %vm321_vm9 = vcmp.lt.s32.totalorder %v320_v26, 15  ;;  %v1393_v28 = vperm.slane %v318_v25, 0  ;;  %v1395_v29 = vperm.slane %v318_v25, 1  ;;  %v1400_v32 = vperm.slane %v314_v24, 0 }
  0x3b   : > { %v322_v31 = vsel %vm321_vm9, %v320_v26, 15  ;;  %v1402_v33 = vperm.slane %v314_v24, 1 }
  0x3c   : > { %vm355_vm10 = vcmp.eq.s32.totalorder %v306_v6, %v1393_v28  ;;  %v1408_v35 = vperm.slane %v322_v31, 0  ;;  %vm356_vm11 = vcmp.eq.s32.totalorder %v306_v6, %v1395_v29  ;;  %v1411_v36 = vperm.slane %v322_v31, 1 }
  0x3d   : > { %v392_v37 = vsel %vm355_vm10, %v1386_v22, 0.0  ;;  %v393_v38 = vsel %vm356_vm11, %v1391_v27, 0.0  ;;  %vm353_vm12 = vcmp.eq.s32.totalorder %v305_v9, %v1393_v28  ;;  %vm354_vm13 = vcmp.eq.s32.totalorder %v305_v9, %v1395_v29 }
  0x3e   : > { %vm426_vm14 = vcmp.eq.s32.totalorder %v306_v6, %v1408_v35  ;;  %vm427_vm15 = vcmp.eq.s32.totalorder %v306_v6, %v1411_v36  ;;  %v390_v39 = vsel %vm353_vm12, %v1386_v22, 0.0  ;;  %vm424_vm0 = vcmp.eq.s32.totalorder %v305_v9, %v1408_v35 }
  0x3f   : > { %v463_v40 = vsel %vm426_vm14, %v1400_v32, 0.0  ;;  %v464_v41 = vsel %vm427_vm15, %v1402_v33, 0.0  ;;  %v461_v42 = vsel %vm424_vm0, %v1400_v32, 0.0  ;;  %v391_v43 = vsel %vm354_vm13, %v1391_v27, 0.0 }
  0x40   : > { %v495_v44 = vadd.f32 %v463_v40, %v392_v37  ;;  %v496_v45 = vadd.f32 %v464_v41, %v393_v38  ;;  %v493_v46 = vadd.f32 %v461_v42, %v390_v39  ;;  %vm425_vm1 = vcmp.eq.s32.totalorder %v305_v9, %v1411_v36 }
  0x41   : > { %v462_v47 = vsel %vm425_vm1, %v1402_v33, 0.0  ;;  %vm351_vm2 = vcmp.eq.s32.totalorder %v1363_v10, %v1393_v28  ;;  %vm422_vm3 = vcmp.eq.s32.totalorder %v1363_v10, %v1408_v35  ;;  %vm352_vm4 = vcmp.eq.s32.totalorder %v1363_v10, %v1395_v29 }
  0x42   : > { %555 = vmatpush.msra.mxu0 %v495_v44  ;;  %905 = vmatpush.msra.mxu2 %v495_v44  ;;  %v494_v48 = vadd.f32 %v462_v47, %v391_v43  ;;  %v388_v49 = vsel %vm351_vm2, %v1386_v22, 0.0  ;;  %v459_v50 = vsel %vm422_vm3, %v1400_v32, 0.0  ;;  %v389_v51 = vsel %vm352_vm4, %v1391_v27, 0.0 }
  0x43   : > { %596 = vmatpush.msra.mxu1 %v496_v45  ;;  %921 = vmatpush.msra.mxu3 %v496_v45  ;;  %v491_v52 = vadd.f32 %v459_v50, %v388_v49  ;;  %vm423_vm5 = vcmp.eq.s32.totalorder %v1363_v10, %v1411_v36  ;;  %vm349_vm6 = vcmp.eq.s32.totalorder %v1366_v11, %v1393_v28 }
  0x44   : > { %556 = vmatpush.msra.mxu0 %v493_v46  ;;  %906 = vmatpush.msra.mxu2 %v493_v46  ;;  %v460_v54 = vsel %vm423_vm5, %v1402_v33, 0.0  ;;  %v386_v55 = vsel %vm349_vm6, %v1386_v22, 0.0  ;;  %vm420_vm7 = vcmp.eq.s32.totalorder %v1366_v11, %v1408_v35  ;;  %vm350_vm8 = vcmp.eq.s32.totalorder %v1366_v11, %v1395_v29 }
  0x45   : > { %597 = vmatpush.msra.mxu1 %v494_v48  ;;  %922 = vmatpush.msra.mxu3 %v494_v48  ;;  %v492_v56 = vadd.f32 %v460_v54, %v389_v51  ;;  %v457_v57 = vsel %vm420_vm7, %v1400_v32, 0.0  ;;  %v387_v58 = vsel %vm350_vm8, %v1391_v27, 0.0  ;;  %vm421_vm9 = vcmp.eq.s32.totalorder %v1366_v11, %v1411_v36 }
  0x46   : > { %557 = vmatpush.msra.mxu0 %v491_v52  ;;  %907 = vmatpush.msra.mxu2 %v491_v52  ;;  %v489_v59 = vadd.f32 %v457_v57, %v386_v55  ;;  %v458_v60 = vsel %vm421_vm9, %v1402_v33, 0.0  ;;  %vm347_vm10 = vcmp.eq.s32.totalorder %v1369_v12, %v1393_v28  ;;  %vm418_vm11 = vcmp.eq.s32.totalorder %v1369_v12, %v1408_v35 }
  0x47   : > { %598 = vmatpush.msra.mxu1 %v492_v56  ;;  %923 = vmatpush.msra.mxu3 %v492_v56  ;;  %v490_v61 = vadd.f32 %v458_v60, %v387_v58  ;;  %v384_v62 = vsel %vm347_vm10, %v1386_v22, 0.0  ;;  %v455_v63 = vsel %vm418_vm11, %v1400_v32, 0.0  ;;  %vm348_vm12 = vcmp.eq.s32.totalorder %v1369_v12, %v1395_v29 }
  0x48   : > { %558 = vmatpush.msra.mxu0 %v489_v59  ;;  %908 = vmatpush.msra.mxu2 %v489_v59  ;;  %v487_v0 = vadd.f32 %v455_v63, %v384_v62  ;;  %v385_v2 = vsel %vm348_vm12, %v1391_v27, 0.0  ;;  %vm419_vm13 = vcmp.eq.s32.totalorder %v1369_v12, %v1411_v36  ;;  %vm345_vm14 = vcmp.eq.s32.totalorder %v1372_v13, %v1393_v28 }
  0x49   : > { %599 = vmatpush.msra.mxu1 %v490_v61  ;;  %924 = vmatpush.msra.mxu3 %v490_v61  ;;  %v456_v3 = vsel %vm419_vm13, %v1402_v33, 0.0  ;;  %v382_v4 = vsel %vm345_vm14, %v1386_v22, 0.0  ;;  %vm416_vm15 = vcmp.eq.s32.totalorder %v1372_v13, %v1408_v35  ;;  %vm346_vm0 = vcmp.eq.s32.totalorder %v1372_v13, %v1395_v29 }
  0x4a   : > { %559 = vmatpush.msra.mxu0 %v487_v0  ;;  %909 = vmatpush.msra.mxu2 %v487_v0  ;;  %v488_v5 = vadd.f32 %v456_v3, %v385_v2  ;;  %v453_v6 = vsel %vm416_vm15, %v1400_v32, 0.0  ;;  %v383_v7 = vsel %vm346_vm0, %v1391_v27, 0.0  ;;  %vm417_vm1 = vcmp.eq.s32.totalorder %v1372_v13, %v1411_v36 }
  0x4b   : > { %v485_v8 = vadd.f32 %v453_v6, %v382_v4  ;;  %v454_v9 = vsel %vm417_vm1, %v1402_v33, 0.0  ;;  %vm343_vm2 = vcmp.eq.s32.totalorder %v1375_v14, %v1393_v28  ;;  %vm414_vm3 = vcmp.eq.s32.totalorder %v1375_v14, %v1408_v35 }
  0x4c   : > { %600 = vmatpush.msra.mxu1 %v488_v5  ;;  %925 = vmatpush.msra.mxu3 %v488_v5  ;;  %v486_v10 = vadd.f32 %v454_v9, %v383_v7  ;;  %v380_v11 = vsel %vm343_vm2, %v1386_v22, 0.0  ;;  %v451_v12 = vsel %vm414_vm3, %v1400_v32, 0.0  ;;  %vm344_vm4 = vcmp.eq.s32.totalorder %v1375_v14, %v1395_v29 }
  0x4d   : > { %560 = vmatpush.msra.mxu0 %v485_v8  ;;  %910 = vmatpush.msra.mxu2 %v485_v8  ;;  %v483_v13 = vadd.f32 %v451_v12, %v380_v11  ;;  %v381_v15 = vsel %vm344_vm4, %v1391_v27, 0.0  ;;  %vm415_vm5 = vcmp.eq.s32.totalorder %v1375_v14, %v1411_v36  ;;  %vm341_vm6 = vcmp.eq.s32.totalorder %v1378_v17, %v1393_v28 }
  0x4e   : > { %601 = vmatpush.msra.mxu1 %v486_v10  ;;  %926 = vmatpush.msra.mxu3 %v486_v10  ;;  %v452_v16 = vsel %vm415_vm5, %v1402_v33, 0.0  ;;  %v378_v20 = vsel %vm341_vm6, %v1386_v22, 0.0  ;;  %vm412_vm7 = vcmp.eq.s32.totalorder %v1378_v17, %v1408_v35  ;;  %vm342_vm8 = vcmp.eq.s32.totalorder %v1378_v17, %v1395_v29 }
  0x4f   : > { %561 = vmatpush.msra.mxu0 %v483_v13  ;;  %911 = vmatpush.msra.mxu2 %v483_v13  ;;  %v484_v21 = vadd.f32 %v452_v16, %v381_v15  ;;  %v449_v14 = vsel %vm412_vm7, %v1400_v32, 0.0  ;;  %v379_v24 = vsel %vm342_vm8, %v1391_v27, 0.0  ;;  %vm413_vm9 = vcmp.eq.s32.totalorder %v1378_v17, %v1411_v36  ;;  %v547_v13 = vld [vmem:[%s1348_s6] sm:$0xff]  ;;  %v550_v16 = vld [vmem:[%s1348_s6 + $0x18] sm:$0xff] }
  0x50   : > { %v481_v25 = vadd.f32 %v449_v14, %v378_v20  ;;  %v450_v26 = vsel %vm413_vm9, %v1402_v33, 0.0  ;;  %vm339_vm10 = vcmp.eq.s32.totalorder %v1381_v18, %v1393_v28  ;;  %vm410_vm11 = vcmp.eq.s32.totalorder %v1381_v18, %v1408_v35  ;;  %v551_v15 = vld [vmem:[%s1348_s6 + $0x20] sm:$0xff]  ;;  %v554_v20 = vld [vmem:[%s1348_s6 + $0x38] sm:$0xff] }
  0x51   : > { %602 = vmatpush.msra.mxu1 %v484_v21  ;;  %927 = vmatpush.msra.mxu3 %v484_v21  ;;  %v482_v31 = vadd.f32 %v450_v26, %v379_v24  ;;  %v376_v37 = vsel %vm339_vm10, %v1386_v22, 0.0  ;;  %v447_v38 = vsel %vm410_vm11, %v1400_v32, 0.0  ;;  %vm340_vm12 = vcmp.eq.s32.totalorder %v1381_v18, %v1395_v29  ;;  %v276_v21 = vld [vmem:[#allocation2 + $0x1] ss:$2 sm:$0x3] }
  0x52   : > { %562 = vmatpush.msra.mxu0 %v481_v25  ;;  %912 = vmatpush.msra.mxu2 %v481_v25  ;;  %v479_v17 = vadd.f32 %v447_v38, %v376_v37  ;;  %v377_v39 = vsel %vm340_vm12, %v1391_v27, 0.0  ;;  %vm411_vm13 = vcmp.eq.s32.totalorder %v1381_v18, %v1411_v36  ;;  %vm337_vm14 = vcmp.eq.s32.totalorder %v1384_v19, %v1393_v28  ;;  %v896_v14 = vld [vmem:[%s1357_s27 + $0x1] ss:$2 sm:$0x3] }
  0x53   : > { %603 = vmatpush.msra.mxu1 %v482_v31  ;;  %928 = vmatpush.msra.mxu3 %v482_v31  ;;  %v448_v40 = vsel %vm411_vm13, %v1402_v33, 0.0  ;;  %v374_v41 = vsel %vm337_vm14, %v1386_v22, 0.0  ;;  %vm408_vm15 = vcmp.eq.s32.totalorder %v1384_v19, %v1408_v35  ;;  %vm338_vm0 = vcmp.eq.s32.totalorder %v1384_v19, %v1395_v29 }
  0x54   : > { %563 = vmatpush.msra.mxu0 %v479_v17  ;;  %913 = vmatpush.msra.mxu2 %v479_v17  ;;  %v480_v42 = vadd.f32 %v448_v40, %v377_v39  ;;  %v445_v18 = vsel %vm408_vm15, %v1400_v32, 0.0  ;;  %v375_v43 = vsel %vm338_vm0, %v1391_v27, 0.0  ;;  %vm409_vm1 = vcmp.eq.s32.totalorder %v1384_v19, %v1411_v36 }
  0x55   : > { %v477_v44 = vadd.f32 %v445_v18, %v374_v41  ;;  %v446_v45 = vsel %vm409_vm1, %v1402_v33, 0.0  ;;  %vm335_vm2 = vcmp.eq.s32.totalorder %v1389_v23, %v1393_v28  ;;  %vm406_vm3 = vcmp.eq.s32.totalorder %v1389_v23, %v1408_v35 }
  0x56   : > { %604 = vmatpush.msra.mxu1 %v480_v42  ;;  %929 = vmatpush.msra.mxu3 %v480_v42  ;;  %v478_v46 = vadd.f32 %v446_v45, %v375_v43  ;;  %v372_v47 = vsel %vm335_vm2, %v1386_v22, 0.0  ;;  %v443_v48 = vsel %vm406_vm3, %v1400_v32, 0.0  ;;  %vm336_vm4 = vcmp.eq.s32.totalorder %v1389_v23, %v1395_v29 }
  0x57   : > { %564 = vmatpush.msra.mxu0 %v477_v44  ;;  %914 = vmatpush.msra.mxu2 %v477_v44  ;;  %v475_v19 = vadd.f32 %v443_v48, %v372_v47  ;;  %v373_v49 = vsel %vm336_vm4, %v1391_v27, 0.0  ;;  %vm407_vm5 = vcmp.eq.s32.totalorder %v1389_v23, %v1411_v36  ;;  %vm333_vm6 = vcmp.eq.s32.totalorder %v1398_v30, %v1393_v28 }
  0x58   : > { %605 = vmatpush.msra.mxu1 %v478_v46  ;;  %930 = vmatpush.msra.mxu3 %v478_v46  ;;  %v444_v50 = vsel %vm407_vm5, %v1402_v33, 0.0  ;;  %v370_v51 = vsel %vm333_vm6, %v1386_v22, 0.0  ;;  %vm404_vm7 = vcmp.eq.s32.totalorder %v1398_v30, %v1408_v35  ;;  %vm334_vm8 = vcmp.eq.s32.totalorder %v1398_v30, %v1395_v29 }
  0x59   : > { %565 = vmatpush.msra.mxu0 %v475_v19  ;;  %915 = vmatpush.msra.mxu2 %v475_v19  ;;  %v476_v52 = vadd.f32 %v444_v50, %v373_v49  ;;  %v441_v23 = vsel %vm404_vm7, %v1400_v32, 0.0  ;;  %v371_v54 = vsel %vm334_vm8, %v1391_v27, 0.0  ;;  %vm405_vm9 = vcmp.eq.s32.totalorder %v1398_v30, %v1411_v36 }
  0x5a   : > { %v473_v55 = vadd.f32 %v441_v23, %v370_v51  ;;  %v442_v56 = vsel %vm405_vm9, %v1402_v33, 0.0  ;;  %vm331_vm10 = vcmp.eq.s32.totalorder %v1405_v34, %v1393_v28  ;;  %vm402_vm11 = vcmp.eq.s32.totalorder %v1405_v34, %v1408_v35 }
  0x5b   : > { %606 = vmatpush.msra.mxu1 %v476_v52  ;;  %931 = vmatpush.msra.mxu3 %v476_v52  ;;  %v474_v57 = vadd.f32 %v442_v56, %v371_v54  ;;  %v368_v58 = vsel %vm331_vm10, %v1386_v22, 0.0  ;;  %v439_v59 = vsel %vm402_vm11, %v1400_v32, 0.0  ;;  %vm332_vm12 = vcmp.eq.s32.totalorder %v1405_v34, %v1395_v29 }
  0x5c   : > { %566 = vmatpush.msra.mxu0 %v473_v55  ;;  %916 = vmatpush.msra.mxu2 %v473_v55  ;;  %v471_v30 = vadd.f32 %v439_v59, %v368_v58  ;;  %v369_v60 = vsel %vm332_vm12, %v1391_v27, 0.0  ;;  %vm403_vm13 = vcmp.eq.s32.totalorder %v1405_v34, %v1411_v36  ;;  %vm329_vm14 = vcmp.eq.s32.totalorder %v1441_v53, %v1393_v28 }
  0x5d   : > { %607 = vmatpush.msra.mxu1 %v474_v57  ;;  %932 = vmatpush.msra.mxu3 %v474_v57  ;;  %v440_v61 = vsel %vm403_vm13, %v1402_v33, 0.0  ;;  %v366_v62 = vsel %vm329_vm14, %v1386_v22, 0.0  ;;  %vm400_vm15 = vcmp.eq.s32.totalorder %v1441_v53, %v1408_v35  ;;  %vm330_vm0 = vcmp.eq.s32.totalorder %v1441_v53, %v1395_v29 }
  0x5e   : > { %567 = vmatpush.msra.mxu0 %v471_v30  ;;  %917 = vmatpush.msra.mxu2 %v471_v30  ;;  %v472_v63 = vadd.f32 %v440_v61, %v369_v60  ;;  %v437_v34 = vsel %vm400_vm15, %v1400_v32, 0.0  ;;  %v367_v0 = vsel %vm330_vm0, %v1391_v27, 0.0  ;;  %vm401_vm1 = vcmp.eq.s32.totalorder %v1441_v53, %v1411_v36 }
  0x5f   : > { %v469_v2 = vadd.f32 %v437_v34, %v366_v62  ;;  %v438_v3 = vsel %vm401_vm1, %v1402_v33, 0.0  ;;  %v1575_v4 = vadd.s32 8, %v1355_v1  ;;  %vm325_vm2 = vcmp.eq.s32.totalorder %v1355_v1, %v1393_v28 }
  0x60   : > { %608 = vmatpush.msra.mxu1 %v472_v63  ;;  %933 = vmatpush.msra.mxu3 %v472_v63  ;;  %v470_v5 = vadd.f32 %v438_v3, %v367_v0  ;;  %v362_v6 = vsel %vm325_vm2, %v1386_v22, 0.0  ;;  %vm396_vm3 = vcmp.eq.s32.totalorder %v1355_v1, %v1408_v35  ;;  %vm326_vm4 = vcmp.eq.s32.totalorder %v1355_v1, %v1395_v29 }
  0x61   : > { %568 = vmatpush.msra.mxu0 %v469_v2  ;;  %918 = vmatpush.msra.mxu2 %v469_v2  ;;  %vm327_vm5 = vcmp.eq.s32.totalorder %v1575_v4, %v1393_v28  ;;  %vm398_vm6 = vcmp.eq.s32.totalorder %v1575_v4, %v1408_v35  ;;  %vm328_vm7 = vcmp.eq.s32.totalorder %v1575_v4, %v1395_v29  ;;  %v433_v53 = vsel %vm396_vm3, %v1400_v32, 0.0  ;;  %v552_v29 = vld [vmem:[%s1348_s6 + $0x28] sm:$0xff] }
  0x62   : > { %609 = vmatpush.msra.mxu1 %v470_v5  ;;  %934 = vmatpush.msra.mxu3 %v470_v5  ;;  %v364_v7 = vsel %vm327_vm5, %v1386_v22, 0.0  ;;  %v435_v8 = vsel %vm398_vm6, %v1400_v32, 0.0  ;;  %v365_v9 = vsel %vm328_vm7, %v1391_v27, 0.0  ;;  %vm399_vm8 = vcmp.eq.s32.totalorder %v1575_v4, %v1411_v36 }
  0x63   : > { %v467_v28 = vadd.f32 %v435_v8, %v364_v7  ;;  %v436_v35 = vsel %vm399_vm8, %v1402_v33, 0.0  ;;  %v465_v10 = vadd.f32 %v433_v53, %v362_v6  ;;  %v363_v11 = vsel %vm326_vm4, %v1391_v27, 0.0  ;;  %v548_v27 = vld [vmem:[%s1348_s6 + $0x8] sm:$0xff] }
  0x64   : > { %v468_v12 = vadd.f32 %v436_v35, %v365_v9  ;;  %vm397_vm9 = vcmp.eq.s32.totalorder %v1355_v1, %v1411_v36  ;;  %v553_v36 = vld [vmem:[%s1348_s6 + $0x30] sm:$0xff]  ;;  %v279_v24 = vadd.f32 %v896_v14, %v276_v21 }
  0x65   : > { %569 = vmatpush.msra.mxu0 %v467_v28  ;;  %919 = vmatpush.msra.mxu2 %v467_v28  ;;  %v434_v22 = vsel %vm397_vm9, %v1402_v33, 0.0  ;;  %v549_v33 = vld [vmem:[%s1348_s6 + $0x10] sm:$0xff] }
  0x66   : > { %610 = vmatpush.msra.mxu1 %v468_v12  ;;  %935 = vmatpush.msra.mxu3 %v468_v12  ;;  %v466_v32 = vadd.f32 %v434_v22, %v363_v11  ;;  %v281_v25 = vfloor.f32 %v279_v24 }
  0x67   : > { %570 = vmatpush.msra.mxu0 %v465_v10  ;;  %920 = vmatpush.msra.mxu2 %v465_v10 }
  0x68   : > { %611 = vmatpush.msra.mxu1 %v466_v32  ;;  %936 = vmatpush.msra.mxu3 %v466_v32  ;;  %v940_v26 = vcvt.f32.s32 %v281_v25  ;;  %v288_v17 = vsub.f32 %v279_v24, %v281_v25 }
  0x69   : > { %571 = vmatmul.f32.vlgmr.msra.gmra.mxu0 %v547_v13  ;;  %583 = vmatmul.f32.vlgmr.msra.gmra.mxu2 %v551_v15 }
  0x6a   : > { %612 = vmatmul.f32.vlgmr.msra.gmra.mxu1 %v547_v13  ;;  %624 = vmatmul.f32.vlgmr.msra.gmra.mxu3 %v551_v15  ;;  %v285_v31 = vadd.s32 1, %v940_v26  ;;  %vm505_vm10 = vcmp.gt.s32.totalorder %v940_v26, 0  ;;  %vm497_vm12 = vcmp.ge.s32.totalorder %v940_v26, 0  ;;  %vm498_vm13 = vcmp.lt.s32.totalorder %v940_v26, 16 }
  0x6b   : > { %v506_v37 = vsel %vm505_vm10, %v940_v26, 0  ;;  %v289_v39 = vsub.f32 1.0, %v288_v17  ;;  %vm499_vm2 = vmand %vm497_vm12, %vm498_vm13  ;;  %vm721_vm12 = vcmask 1043456   ;;  %vm727_vm13 = vcmask 1041409  }
  0x6c   : > { %vm509_vm11 = vcmp.gt.s32.totalorder %v285_v31, 0  ;;  %vm501_vm14 = vcmp.ge.s32.totalorder %v285_v31, 0  ;;  %vm502_vm15 = vcmp.lt.s32.totalorder %v285_v31, 16  ;;  %vm507_vm0 = vcmp.lt.s32.totalorder %v506_v37, 15 }
  0x6d   : > { %v510_v38 = vsel %vm509_vm11, %v285_v31, 0  ;;  %vm503_vm3 = vmand %vm501_vm14, %vm502_vm15  ;;  %v508_v40 = vsel %vm507_vm0, %v506_v37, 15  ;;  %v500_v42 = vsel %vm499_vm2, %v289_v39, 0.0  ;;  %vm729_vm14 = vcmask 1045509  }
  0x6e   : > { %vm511_vm1 = vcmp.lt.s32.totalorder %v510_v38, 15  ;;  %v504_v18 = vsel %vm503_vm3, %v288_v17, 0.0  ;;  %v514_v43 = vperm.slane %v508_v40, 1  ;;  %v521_v46 = vperm.slane %v500_v42, 1 }
  0x6f   : > { %v512_v41 = vsel %vm511_vm1, %v510_v38, 15  ;;  %v536_v47 = vperm.slane %v504_v18, 1  ;;  %v513_v19 = vperm.slane %v508_v40, 0  ;;  %v520_v54 = vperm.slane %v500_v42, 0 }
  0x70   : > { %v529_v44 = vperm.slane %v512_v41, 1  ;;  %vm518_vm4 = vcmp.eq.s32.totalorder %v1575_v4, %v514_v43  ;;  %vm516_vm6 = vcmp.eq.s32.totalorder %v1355_v1, %v514_v43  ;;  %v528_v49 = vperm.slane %v512_v41, 0 }
  0x71   : > { %574 = vmatmul.f32.gmra.mxu0 %v548_v27  ;;  %586 = vmatmul.f32.gmra.mxu2 %v552_v29  ;;  %v527_v50 = vsel %vm518_vm4, %v521_v46, 0.0  ;;  %v525_v52 = vsel %vm516_vm6, %v521_v46, 0.0  ;;  %vm517_vm8 = vcmp.eq.s32.totalorder %v1575_v4, %v513_v19  ;;  %v535_v55 = vperm.slane %v504_v18, 0 }
  0x72   : > { %615 = vmatmul.f32.gmra.mxu1 %v548_v27  ;;  %627 = vmatmul.f32.gmra.mxu3 %v552_v29  ;;  %vm533_vm5 = vcmp.eq.s32.totalorder %v1575_v4, %v529_v44  ;;  %vm531_vm7 = vcmp.eq.s32.totalorder %v1355_v1, %v529_v44  ;;  %vm532_vm9 = vcmp.eq.s32.totalorder %v1575_v4, %v528_v49  ;;  %v526_v30 = vsel %vm517_vm8, %v520_v54, 0.0 }
  0x73   : > { %v542_v51 = vsel %vm533_vm5, %v536_v47, 0.0  ;;  %v540_v23 = vsel %vm531_vm7, %v536_v47, 0.0  ;;  %vm515_vm10 = vcmp.eq.s32.totalorder %v1355_v1, %v513_v19  ;;  %vm530_vm11 = vcmp.eq.s32.totalorder %v1355_v1, %v528_v49 }
  0x74   : > { %v1619_v57 = vadd.f32 %v542_v51, %v527_v50  ;;  %v544_v58 = vadd.f32 %v540_v23, %v525_v52  ;;  %v541_v60 = vsel %vm532_vm9, %v535_v55, 0.0  ;;  %v524_v63 = vsel %vm515_vm10, %v520_v54, 0.0 }
  0x75   : > { %v539_v34 = vsel %vm530_vm11, %v535_v55, 0.0  ;;  %v545_v3 = vadd.f32 %v541_v60, %v526_v30  ;;  %vm732_vm15 = vcmask 1042434   ;;  %vm734_vm0 = vcmask 1046534  }
  0x76   : > { %v543_v4 = vadd.f32 %v539_v34, %v524_v63  ;;  %vm737_vm1 = vcmask 1043459   ;;  %vm739_vm2 = vcmask 1047559  }
  0x79   : > { %577 = vmatmul.f32.gmra.mxu0 %v549_v33  ;;  %589 = vmatmul.f32.gmra.mxu2 %v553_v36 }
  0x7a   : > { %618 = vmatmul.f32.gmra.mxu1 %v549_v33  ;;  %630 = vmatmul.f32.gmra.mxu3 %v553_v36 }
  0x81   : > { %580 = vmatmul.f32.gmra.mxu0 %v550_v16  ;;  %592 = vmatmul.f32.gmra.mxu2 %v554_v20 }
  0x82   : > { %621 = vmatmul.f32.gmra.mxu1 %v550_v16  ;;  %633 = vmatmul.f32.gmra.mxu3 %v554_v20 }
  0xe6   : > { %v572_v45 = vpop.f32.mrf.mxu0 }
  0xe7   : > { %v613_v48 = vpop.f32.mrf.mxu1  ;;  %v637_v10 = vmul.f32 %v572_v45, %v543_v4 }
  0xe8   : > { %v638_v2 = vmul.f32 %v613_v48, %v544_v58 }
  0xec   : > { %v584_v56 = vpop.f32.mrf.mxu2 }
  0xed   : > { %v625_v59 = vpop.f32.mrf.mxu3  ;;  %v645_v9 = vmul.f32 %v584_v56, %v543_v4 }
  0xee   : > { %v575_v61 = vpop.f32.mrf.mxu0  ;;  %v646_v1 = vmul.f32 %v625_v59, %v544_v58 }
  0xef   : > { %v616_v62 = vpop.f32.mrf.mxu1  ;;  %v639_v53 = vmul.f32 %v575_v61, %v545_v3 }
  0xf0   : > { %v640_v0 = vmul.f32 %v616_v62, %v1619_v57 }
  0xf1   : > { %v653_v13 = vadd.f32 %v639_v53, %v637_v10 }
  0xf2   : > { %v660_v5 = vadd.f32 %v640_v0, %v638_v2 }
  0xf3   : > { %v654_v16 = vrot.slane %v653_v13, 4 }
  0xf4   : > { %v587_v6 = vpop.f32.mrf.mxu2  ;;  %v661_v11 = vrot.slane %v660_v5, 4 }
  0xf5   : > { %v647_v7 = vmul.f32 %v587_v6, %v545_v3  ;;  %v628_v8 = vpop.f32.mrf.mxu3  ;;  %v655_v39 = vadd.f32 %v654_v16, %v653_v13 }
  0xf6   : > { %v648_v28 = vmul.f32 %v628_v8, %v1619_v57  ;;  %v578_v35 = vpop.f32.mrf.mxu0  ;;  %v662_v27 = vadd.f32 %v661_v11, %v660_v5 }
  0xf7   : > { %v619_v12 = vpop.f32.mrf.mxu1  ;;  %v681_v22 = vadd.f32 %v647_v7, %v645_v9  ;;  %v641_v25 = vmul.f32 %v578_v35, %v543_v4  ;;  %v656_v47 = vrot.slane %v655_v39, 2 }
  0xf8   : > { %v688_v32 = vadd.f32 %v648_v28, %v646_v1  ;;  %v663_v24 = vrot.slane %v662_v27, 2  ;;  %v642_v38 = vmul.f32 %v619_v12, %v544_v58 }
  0xf9   : > { %v682_v29 = vrot.slane %v681_v22, 4  ;;  %v657_v62 = vadd.f32 %v656_v47, %v655_v39 }
  0xfa   : > { %v689_v15 = vrot.slane %v688_v32, 4  ;;  %v664_v18 = vadd.f32 %v663_v24, %v662_v27 }
  0xfb   : > { %v683_v37 = vadd.f32 %v682_v29, %v681_v22  ;;  %v658_v8 = vrot.slane %v657_v62, 1 }
  0xfc   : > { %v690_v33 = vadd.f32 %v689_v15, %v688_v32  ;;  %v590_v36 = vpop.f32.mrf.mxu2  ;;  %v665_v55 = vrot.slane %v664_v18, 1 }
  0xfd   : > { %v631_v20 = vpop.f32.mrf.mxu3  ;;  %v684_v44 = vrot.slane %v683_v37, 2  ;;  %v649_v48 = vmul.f32 %v590_v36, %v543_v4  ;;  %v659_v13 = vadd.f32 %v658_v8, %v657_v62 }
  0xfe   : > { %v691_v21 = vrot.slane %v690_v33, 2  ;;  %v581_v14 = vpop.f32.mrf.mxu0  ;;  %v650_v52 = vmul.f32 %v631_v20, %v544_v58  ;;  %v666_v5 = vadd.f32 %v665_v55, %v664_v18 }
  0xff   : > { %v643_v26 = vmul.f32 %v581_v14, %v545_v3  ;;  %v622_v31 = vpop.f32.mrf.mxu1  ;;  %v685_v30 = vadd.f32 %v684_v44, %v683_v37 }
 0x100   : > { %v644_v17 = vmul.f32 %v622_v31, %v1619_v57  ;;  %v692_v41 = vadd.f32 %v691_v21, %v690_v33  ;;  %v717_v35 = vrot.slane %v666_v5, 4 }
 0x101   : > { %v667_v40 = vadd.f32 %v643_v26, %v641_v25  ;;  %v686_v6 = vrot.slane %v685_v30, 1 }
 0x102   : > { %v674_v42 = vadd.f32 %v644_v17, %v642_v38  ;;  %v693_v51 = vrot.slane %v692_v41, 1  ;;  %v722_v16 = vsel %vm721_vm12, %v659_v13, %v717_v35 }
 0x103   : > { %v668_v43 = vrot.slane %v667_v40, 4  ;;  %v687_v11 = vadd.f32 %v686_v6, %v685_v30 }
 0x104   : > { %v675_v45 = vrot.slane %v674_v42, 4  ;;  %v593_v46 = vpop.f32.mrf.mxu2  ;;  %v694_v0 = vadd.f32 %v693_v51, %v692_v41 }
 0x105   : > { %v669_v19 = vadd.f32 %v668_v43, %v667_v40  ;;  %v651_v49 = vmul.f32 %v593_v46, %v545_v3  ;;  %v634_v50 = vpop.f32.mrf.mxu3 }
 0x106   : > { %v676_v23 = vadd.f32 %v675_v45, %v674_v42  ;;  %v652_v54 = vmul.f32 %v634_v50, %v1619_v57  ;;  %v719_v9 = vrot.slane %v694_v0, 4 }
 0x107   : > { %v670_v56 = vrot.slane %v669_v19, 2  ;;  %v695_v59 = vadd.f32 %v651_v49, %v649_v48 }
 0x108   : > { %v677_v60 = vrot.slane %v676_v23, 2  ;;  %v702_v61 = vadd.f32 %v652_v54, %v650_v52  ;;  %v724_v15 = vsel %vm721_vm12, %v687_v11, %v719_v9 }
 0x109   : > { %v671_v63 = vadd.f32 %v670_v56, %v669_v19  ;;  %v696_v34 = vrot.slane %v695_v59, 4  ;;  %v731_v21 = vrot.slane %v724_v15, 6 }
 0x10a   : > { %v678_v2 = vadd.f32 %v677_v60, %v676_v23  ;;  %v703_v4 = vrot.slane %v702_v61, 4 }
 0x10b   : > { %v697_v3 = vadd.f32 %v696_v34, %v695_v59  ;;  %v672_v53 = vrot.slane %v671_v63, 1 }
 0x10c   : > { %v679_v58 = vrot.slane %v678_v2, 1  ;;  %v704_v7 = vadd.f32 %v703_v4, %v702_v61 }
 0x10d   : > { %v698_v57 = vrot.slane %v697_v3, 2  ;;  %v673_v12 = vadd.f32 %v672_v53, %v671_v63 }
 0x10e   : > { %v680_v1 = vadd.f32 %v679_v58, %v678_v2  ;;  %v705_v28 = vrot.slane %v704_v7, 2 }
 0x10f   : > { %v699_v10 = vadd.f32 %v698_v57, %v697_v3 }
 0x110   : > { %v718_v22 = vrot.slane %v680_v1, 4  ;;  %v706_v32 = vadd.f32 %v705_v28, %v704_v7 }
 0x111   : > { %v700_v29 = vrot.slane %v699_v10, 1 }
 0x112   : > { %v723_v27 = vsel %vm721_vm12, %v673_v12, %v718_v22  ;;  %v707_v33 = vrot.slane %v706_v32, 1 }
 0x113   : > { %v726_v36 = vrot.slane %v723_v27, 7  ;;  %v701_v24 = vadd.f32 %v700_v29, %v699_v10 }
 0x114   : > { %v708_v20 = vadd.f32 %v707_v33, %v706_v32 }
 0x115   : > { %v728_v14 = vsel %vm727_vm13, %v726_v36, %v722_v16 }
 0x116   : > { %v720_v25 = vrot.slane %v708_v20, 4  ;;  %v730_v26 = vsel %vm729_vm14, %v726_v36, %v728_v14 }
 0x117   : > { %v733_v31 = vsel %vm732_vm15, %v731_v21, %v730_v26 }
 0x118   : > { %v725_v37 = vsel %vm721_vm12, %v701_v24, %v720_v25  ;;  %v735_v17 = vsel %vm734_vm0, %v731_v21, %v733_v31 }
 0x119   : > { %v736_v38 = vrot.slane %v725_v37, 5 }
 0x11b   : > { %v738_v39 = vsel %vm737_vm1, %v736_v38, %v735_v17 }
 0x11c   : > { %v740_v40 = vsel %vm739_vm2, %v736_v38, %v738_v39 }
 0x11d   : > { %742 = vst [vmem:[%s268_s15] sm:$0xff] %v740_v40 }
 0x11e   : > { %1138 = shalt.err (!%p1135_p13)
}
 0x11f   : > { %949 = dma.vmem_to_hbm [thread:$0]  (%p1310_p0), %s760_s8, 128, %s762_s9, %s744_s11  }
 0x120 PF: > { %s773_s28 = sand.u32 1, %s1177_s12   ;;  %p963_p4 = pnand %p884_p3, %p1314_p2 }
 0x121   : > { %s774_s27 = scalar_lea.sflag [#allocation4], %s773_s28 }
 0x122   : > { %p964_p5 = pneg %p963_p4 }
 0x124   : > { %1172 = dma.done.wait (%p964_p5), %s774_s27, 128  }
 0x125   : > { %1174 = vsyncadd (%p964_p5), %s774_s27, 4294967168  ;;  %s20_s17 = sadd.s32 1, %s1197_s17   ;;  %s1680_s12 = smov %s1181_s13 }
 0x126   : > { %p17_p1 = scmp.ge.s32.totalorder %s20_s17, 4   ;;  %s1681_s13 = smov %s1185_s14 }
 0x127   : > { %s1682_s14 = smov %s1274_s25  ;;  %s1683_s15 = smov %s1193_s16 }
 0x128   : > { %s1684_s16 = smov %s1686_s18  ;;  %19 = sbr.rel (!%p17_p1) target bundleno = 7 (0x7), region = 96 }
 0x12d   :  { %780 = vsyncpa [#allocation3], 1 }
 0x12e   :  { %782 = vsyncpa [#allocation3 + $0x1], 1 }
 0x12f   :  { %783 = vsyncpa [#allocation6], 1 }
 0x130   :  { %785 = vsyncpa [#allocation6 + $0x1], 1 }
 0x131   :  { %786 = vsyncpa [#allocation4], 1 }
 0x132   :  { %788 = vsyncpa [#allocation4 + $0x1], 1 }

</bundles_post_ra>
